<compile_context>
chip_gen: v7x
topology: tpu7x:2x2x1
jax: 0.10.0
libtpu: 0.0.40
codegen_flags: <defaults>
</compile_context>

<pallas_src>
import functools

import jax
import jax.numpy as jnp
import numpy as np
from jax.experimental import pallas as pl
from jax.experimental.pallas import tpu as pltpu

CP = 128  # padded channel width (one full lane vreg width)


# ---------------------------------------------------------------------------
# Per-generation VMEM budgeting
# ---------------------------------------------------------------------------
@functools.lru_cache(maxsize=None)
def _vmem_capacity_bytes():
    try:
        info = pltpu.get_tpu_info()
        cap = int(getattr(info, "vmem_capacity_bytes", 0) or 0)
        if cap <= 0:
            cap = 64 << 20
    except Exception:
        cap = 64 << 20  # conservative (v7x per-TC VMEM)
    return cap


def _vmem_limit_bytes():
    # ~75% of physical VMEM: ~96 MiB on v5e/v6e, ~48 MiB on v7x.
    return int(_vmem_capacity_bytes() * 3 // 4)


def _tile_budget_bytes():
    # Fraction of the limit that user-visible (double-)buffers may consume.
    return int(_vmem_limit_bytes() * 3 // 4)


def _spec(block_shape, index_map, *, single_buffered=False):
    """BlockSpec; grid-invariant operands get a single pipeline buffer when supported."""
    if single_buffered and hasattr(pl, "Buffered"):
        try:
            return pl.BlockSpec(block_shape, index_map, pipeline_mode=pl.Buffered(1))
        except TypeError:
            pass
    return pl.BlockSpec(block_shape, index_map)


def _pick_row_tile(n, *, fixed_bytes, bytes_per_row, override=None, cap=1024):
    """Largest row tile (multiple of 16, divides n) fitting the VMEM budget; prefers an
    even number of grid steps so v7x's two TensorCores split the 'parallel' axis evenly."""
    if override is not None:
        return override
    if n % 16 != 0:
        return n
    budget = _tile_budget_bytes()
    cands = [t for t in range(16, min(n, cap) + 1, 16)
             if n % t == 0 and fixed_bytes + t * bytes_per_row <= budget]
    if not cands:
        return 16
    even = [t for t in cands if (n // t) % 2 == 0]
    return max(even) if even else max(cands)


def _pick_k_tile(n, cap=2048):
    """Contraction tile for A@x: multiple of 128 dividing n (or full n)."""
    if n % 128 != 0:
        return n
    tk = 128
    while tk * 2 <= min(n, cap) and n % (tk * 2) == 0:
        tk *= 2
    return tk


# ---------------------------------------------------------------------------
# Pallas kernels
# ---------------------------------------------------------------------------
def sage_res_block_kernel(a_ref, xk_ref, xrow_ref, invdeg_ref, wcat_ref, b_ref,
                          o_ref, acc_ref):
    """Fused SAGEConv(mean) + residual shortcut + ReLU, K-tiled aggregation.

    a:      [TM, TK]     bf16 adjacency tile ({0,1,..} edge counts, un-normalized)
    xk:     [TK, CP]     bf16 x strip along the contraction axis
    xrow:   [TM, CP]     bf16 x row strip (root path)
    invdeg: [TM, 1]      f32  1/deg row scale (f32 epilogue -> exact mean)
    wcat:   [2*CP, CP]   bf16 concat([W_l, W_r + W_sc], axis=0) (one 256-deep MXU pass)
    b:      [1, CP]      f32  fused bias = b_l + b_sc
    o:      [TM, CP]     bf16
    acc:    [TM, CP]     f32  VMEM accumulator scratch
    """
    k = pl.program_id(1)

    @pl.when(k == 0)
    def _():
        acc_ref[...] = jnp.zeros_like(acc_ref)

    acc_ref[...] += jnp.dot(a_ref[...], xk_ref[...],
                            preferred_element_type=jnp.float32)

    @pl.when(k == pl.num_programs(1) - 1)
    def _():
        agg = (acc_ref[...] * invdeg_ref[...]).astype(jnp.bfloat16)      # mean aggregation
        proj_in = jnp.concatenate([agg, xrow_ref[...]], axis=-1)          # [TM, 2*CP] bf16
        h = jnp.dot(proj_in, wcat_ref[...],
                    preferred_element_type=jnp.float32) + b_ref[...]      # f32 epilogue
        o_ref[...] = jnp.maximum(h, 0.0).astype(o_ref.dtype)


def fused_concat_pool_kernel(*refs, n_parts, num_graphs, ng_pad):
    """Fused Linear(concat(x_1..x_P)) + global_max_pool for one row strip.

    refs: batch [TM,1] i32, x_1..x_P [TM,CP] bf16, w_cat [P*CP,CP] bf16, b [1,CP] f32,
          out [ng_pad, CP] f32 (resident running-max accumulator).
    """
    batch_ref = refs[0]
    part_refs = refs[1:1 + n_parts]
    wcat_ref = refs[1 + n_parts]
    b_ref = refs[2 + n_parts]
    o_ref = refs[3 + n_parts]

    @pl.when(pl.program_id(0) == 0)
    def _():
        o_ref[...] = jnp.full_like(o_ref, -1e30)

    xin = jnp.concatenate([r[...] for r in part_refs], axis=-1)           # [TM, P*CP] bf16
    acc = jnp.dot(xin, wcat_ref[...],
                  preferred_element_type=jnp.float32) + b_ref[...]        # [TM, CP] f32

    bcol = batch_ref[...]                                                 # [TM, 1] int32
    rows = []
    # TODO(synk): static per-graph loop is fine for small batches; for many graphs use a
    #             per-graph grid with scalar-prefetched node offsets instead.
    for g in range(num_graphs):
        masked = jnp.where(bcol == g, acc, jnp.float32(-1e30))
        rows.append(jnp.max(masked, axis=0, keepdims=True))
    for _ in range(ng_pad - num_graphs):
        rows.append(jnp.full((1, acc.shape[1]), -1e30, jnp.float32))
    o_ref[...] = jnp.maximum(o_ref[...], jnp.concatenate(rows, axis=0))


def fused_head_kernel(x_ref, *refs, n_layers):
    """Entire head MLP in one launch: Linear(+ReLU) x (L-1), then Linear."""
    o_ref = refs[-1]
    h = x_ref[...].astype(jnp.float32)
    for i in range(n_layers):
        w = refs[2 * i][...]
        b = refs[2 * i + 1][...]
        h = jnp.dot(h.astype(jnp.bfloat16), w,
                    preferred_element_type=jnp.float32) + b
        if i < n_layers - 1:
            h = jnp.maximum(h, 0.0)
        # TODO(synk): dropout(0.5) between head layers is identity in eval mode.
    o_ref[...] = h


# ---------------------------------------------------------------------------
# pallas_call wrappers
# ---------------------------------------------------------------------------
def sage_res_block(a01, inv_deg, x, layer, row_tile=None):
    n, cp = x.shape
    tk = _pick_k_tile(n)
    fixed = 2 * cp * cp * 2 + cp * 4 + 2 * tk * cp * 2              # w_cat + bias + x K-strip
    per_row = (2 * tk * 2        # A strip (2 bufs, bf16)
               + 2 * cp * 2      # x row strip (2 bufs)
               + 2 * cp * 2      # output strip (2 bufs)
               + cp * 4          # f32 accumulator scratch
               + 2 * 4)          # 1/deg column (2 bufs)
    tm = _pick_row_tile(n, fixed_bytes=fixed, bytes_per_row=per_row, override=row_tile)
    return pl.pallas_call(
        sage_res_block_kernel,
        out_shape=jax.ShapeDtypeStruct((n, cp), jnp.bfloat16),
        grid=(n // tm, n // tk),
        in_specs=[
            pl.BlockSpec((tm, tk), lambda i, k: (i, k)),                       # A tile
            pl.BlockSpec((tk, cp), lambda i, k: (k, 0)),                       # x K-strip
            pl.BlockSpec((tm, cp), lambda i, k: (i, 0)),                       # x row strip
            pl.BlockSpec((tm, 1), lambda i, k: (i, 0)),                        # 1/deg
            _spec((2 * cp, cp), lambda i, k: (0, 0), single_buffered=True),    # w_cat
            _spec((1, cp), lambda i, k: (0, 0), single_buffered=True),         # bias
        ],
        out_specs=pl.BlockSpec((tm, cp), lambda i, k: (i, 0)),
        scratch_shapes=[pltpu.VMEM((tm, cp), jnp.float32)],
        compiler_params=pltpu.CompilerParams(
            dimension_semantics=("parallel", "arbitrary"),
            vmem_limit_bytes=_vmem_limit_bytes()),
    )(a01, x, x, inv_deg, layer["w_cat"], layer["b"])


def fused_concat_pool(batch_col, parts, w_cat, b, num_graphs, ng_pad, row_tile=None):
    n, cp = parts[0].shape
    n_parts = len(parts)
    fixed = n_parts * cp * cp * 2 + cp * 4 + ng_pad * cp * 4
    per_row = n_parts * 2 * cp * 2 + 2 * 4
    tm = _pick_row_tile(n, fixed_bytes=fixed, bytes_per_row=per_row,
                        override=row_tile, cap=2048)
    operands = [batch_col]
    in_specs = [pl.BlockSpec((tm, 1), lambda i: (i, 0))]
    for p in parts:
        operands.append(p)
        in_specs.append(pl.BlockSpec((tm, cp), lambda i: (i, 0)))
    operands.append(w_cat)
    in_specs.append(_spec((n_parts * cp, cp), lambda i: (0, 0), single_buffered=True))
    operands.append(b)
    in_specs.append(_spec((1, cp), lambda i: (0, 0), single_buffered=True))
    return pl.pallas_call(
        functools.partial(fused_concat_pool_kernel, n_parts=n_parts,
                          num_graphs=num_graphs, ng_pad=ng_pad),
        out_shape=jax.ShapeDtypeStruct((ng_pad, cp), jnp.float32),
        grid=(n // tm,),
        in_specs=in_specs,
        out_specs=pl.BlockSpec((ng_pad, cp), lambda i: (0, 0)),   # resident running max
        compiler_params=pltpu.CompilerParams(
            dimension_semantics=("arbitrary",),
            vmem_limit_bytes=_vmem_limit_bytes()),
    )(*operands)


def fused_head_mlp(x, head_params):
    rows, cp = x.shape
    operands = [x]
    for w, b in head_params:
        operands += [w, b]
    vspec = pl.BlockSpec(memory_space=pltpu.MemorySpace.VMEM)
    return pl.pallas_call(
        functools.partial(fused_head_kernel, n_layers=len(head_params)),
        out_shape=jax.ShapeDtypeStruct((rows, cp), jnp.float32),
        in_specs=[vspec] * len(operands),
        out_specs=vspec,
        compiler_params=pltpu.CompilerParams(vmem_limit_bytes=_vmem_limit_bytes()),
    )(*operands)


# ---------------------------------------------------------------------------
# Parameter init (PyTorch-Linear-style) + kernel-ready preparation
# ---------------------------------------------------------------------------
def pad2(a, rows, cols):
    return jnp.zeros((rows, cols), a.dtype).at[:a.shape[0], :a.shape[1]].set(a)


def init_linear(key, c_in, c_out, bias=True):
    k1, k2 = jax.random.split(key)
    bound = 1.0 / np.sqrt(c_in)
    w = jax.random.uniform(k1, (c_in, c_out), jnp.float32, -bound, bound)
    b = (jax.random.uniform(k2, (1, c_out), jnp.float32, -bound, bound)
         if bias else jnp.zeros((1, c_out), jnp.float32))
    return w, b


def init_sage_res_block(key, c_in, c_out):
    k1, k2, k3 = jax.random.split(key, 3)
    wl, bl = init_linear(k1, c_in, c_out, bias=True)     # lin_l (aggregated neighbors)
    wr, _ = init_linear(k2, c_in, c_out, bias=False)     # lin_r (root, no bias)
    if c_in == c_out:                                    # identity shortcut
        wsc = jnp.eye(c_in, dtype=jnp.float32)
        bsc = jnp.zeros((1, c_out), jnp.float32)
    else:                                                # linear shortcut
        wsc, bsc = init_linear(k3, c_in, c_out, bias=True)
    return {"wl": wl, "bl": bl, "wr": wr, "wsc": wsc, "bsc": bsc}


def init_model(key, block_channels, aggr_channels, head_channels):
    params = {"blocks": [], "head": []}
    for channels in block_channels:
        layers = []
        for c_in, c_out in zip(channels, channels[1:]):
            key, sub = jax.random.split(key)
            layers.append(init_sage_res_block(sub, c_in, c_out))
        params["blocks"].append(layers)
    key, sub = jax.random.split(key)
    params["aggr_w"], params["aggr_b"] = init_linear(sub, *aggr_channels)
    for c_in, c_out in zip(head_channels, head_channels[1:]):
        key, sub = jax.random.split(key)
        params["head"].append(init_linear(sub, c_in, c_out))
    return params


def prepare_params(params, block_channels, head_channels):
    """Fold shortcut into the root matmul, stack projection weights along K (256-deep MXU
    pass), zero-pad to 128 lanes, and cast matmul weights to bf16."""
    prep = {"blocks": [], "out_dim": head_channels[-1]}
    for layers in params["blocks"]:
        blk = []
        for lp in layers:
            w_root = lp["wr"] + lp["wsc"]
            w_cat = jnp.concatenate([pad2(lp["wl"], CP, CP),
                                     pad2(w_root, CP, CP)], axis=0)       # [2*CP, CP]
            blk.append({"w_cat": w_cat.astype(jnp.bfloat16),
                        "b": pad2(lp["bl"] + lp["bsc"], 1, CP)})
        prep["blocks"].append(blk)
    widths = [ch[-1] for ch in block_channels]
    offs = np.concatenate([[0], np.cumsum(widths)])
    parts = [pad2(params["aggr_w"][offs[i]:offs[i + 1], :], CP, CP)
             for i in range(len(widths))]
    prep["aggr_wcat"] = jnp.concatenate(parts, axis=0).astype(jnp.bfloat16)  # [P*CP, CP]
    prep["aggr_b"] = pad2(params["aggr_b"], 1, CP)
    prep["head"] = [(pad2(w, CP, CP).astype(jnp.bfloat16), pad2(b, 1, CP))
                    for w, b in params["head"]]
    return prep


# ---------------------------------------------------------------------------
# Forward pass (glue in plain JAX, hot path in Pallas)
# ---------------------------------------------------------------------------
def build_adjacency(edge_index, num_nodes):
    """Un-normalized dense adjacency (exact small-int counts in bf16) + f32 1/deg."""
    src, dst = edge_index[0], edge_index[1]
    a = jnp.zeros((num_nodes, num_nodes), jnp.float32).at[dst, src].add(1.0)
    deg = jnp.sum(a, axis=1, keepdims=True)
    inv_deg = 1.0 / jnp.maximum(deg, 1.0)
    return a.astype(jnp.bfloat16), inv_deg


def sage_gcn_forward(prep, x, edge_index, batch, num_graphs, row_tile=None):
    n = x.shape[0]
    a01, inv_deg = build_adjacency(edge_index, n)                 # [N,N] bf16, [N,1] f32
    h = pad2(x, n, CP).astype(jnp.bfloat16)                       # [N,CP] bf16
    batch_col = batch.astype(jnp.int32)[:, None]                  # [N,1]  int32

    xs = []                                                       # block outputs
    for block in prep["blocks"]:
        for layer in block:
            h = sage_res_block(a01, inv_deg, h, layer, row_tile=row_tile)
        xs.append(h)

    ng_pad = max(8, -(-num_graphs // 8) * 8)                      # 8-row-aligned pool output
    pooled = fused_concat_pool(batch_col, xs, prep["aggr_wcat"], prep["aggr_b"],
                               num_graphs, ng_pad, row_tile=row_tile)
    pooled = pooled.at[num_graphs:].set(0.0)                      # neutralize sentinel rows
    out = fused_head_mlp(pooled, prep["head"])                    # [ng_pad, CP] f32
    return out[:num_graphs, :prep["out_dim"]]


# ---------------------------------------------------------------------------
if __name__ == "__main__":
    key = jax.random.PRNGKey(0)

    # model config
    block_channels = [[8, 16, 16], [16, 32]]   # block1: 8->16->16, block2: 16->32
    aggr_channels = [16 + 32, 32]              # concat(block outputs) -> 32
    head_channels = [32, 64, 4]                # MLP head -> 4 classes

    # synthetic batched graph: 2 graphs x 64 nodes, 8 input features
    num_graphs, nodes_per_graph, c_in = 2, 64, 8
    n = num_graphs * nodes_per_graph
    e_per_graph = 192

    key, kx, ks, kd = jax.random.split(key, 4)
    x = jax.random.normal(kx, (n, c_in), jnp.float32)
    src_chunks, dst_chunks = [], []
    for g in range(num_graphs):
        ks, k1 = jax.random.split(ks)
        kd, k2 = jax.random.split(kd)
        src_chunks.append(g * nodes_per_graph
                          + jax.random.randint(k1, (e_per_graph,), 0, nodes_per_graph))
        dst_chunks.append(g * nodes_per_graph
                          + jax.random.randint(k2, (e_per_graph,), 0, nodes_per_graph))
    edge_index = jnp.stack([jnp.concatenate(src_chunks), jnp.concatenate(dst_chunks)], axis=0)
    batch = jnp.repeat(jnp.arange(num_graphs, dtype=jnp.int32), nodes_per_graph)

    key, kp = jax.random.split(key)
    params = init_model(kp, block_channels, aggr_channels, head_channels)
    prep = prepare_params(params, block_channels, head_channels)

    # row_tile=64 -> 2 row strips, exercising the gridded / pipelined / accumulator paths
    out = sage_gcn_forward(prep, x, edge_index, batch, num_graphs, row_tile=64)
    out = jax.block_until_ready(out)
    assert out.shape == (num_graphs, head_channels[-1]), out.shape
    assert bool(jnp.all(jnp.isfinite(out)))
    print("KERNEL_OK")
</pallas_src>

<mosaic_0001>
module attributes {stable_mosaic.version = 11 : i64} {
  func.func @sage_res_block_kernel(%arg0: i32, %arg1: i32, %arg2: memref<64x128xbf16, #tpu.memory_space<vmem>>, %arg3: memref<128x128xbf16, #tpu.memory_space<vmem>>, %arg4: memref<64x128xbf16, #tpu.memory_space<vmem>>, %arg5: memref<64x1xf32, #tpu.memory_space<vmem>>, %arg6: memref<256x128xbf16, #tpu.memory_space<vmem>>, %arg7: memref<1x128xf32, #tpu.memory_space<vmem>>, %arg8: memref<64x128xbf16, #tpu.memory_space<vmem>>, %arg9: memref<64x128xf32, #tpu.memory_space<vmem>>) attributes {dimension_semantics = [#tpu.dimension_semantics<parallel>, #tpu.dimension_semantics<arbitrary>], iteration_bounds = array<i64: 2, 1>, scalar_prefetch = 0 : i64, scratch_operands = 1 : i64, tpu.core_type = #tpu.core_type<tc>, window_params = [{transform_indices = @transform_0, window_bounds = array<i64: 64, 128>}, {transform_indices = @transform_1, window_bounds = array<i64: 128, 128>}, {transform_indices = @transform_2, window_bounds = array<i64: 64, 128>}, {transform_indices = @transform_3, window_bounds = array<i64: 64, 1>}, {pipeline_mode = #tpu.pipeline_mode<synchronous>, transform_indices = @transform_4, window_bounds = array<i64: 256, 128>}, {pipeline_mode = #tpu.pipeline_mode<synchronous>, transform_indices = @transform_5, window_bounds = array<i64: 1, 128>}, {transform_indices = @transform_6, window_bounds = array<i64: 64, 128>}]} {
    %c0_i32 = arith.constant 0 : i32
    %0 = arith.cmpi eq, %arg1, %c0_i32 : i32
    %1 = arith.extui %0 : i1 to i32
    %c0_i32_0 = arith.constant 0 : i32
    %2 = arith.cmpi ne, %1, %c0_i32_0 : i32
    scf.if %2 {
      %cst_10 = arith.constant 0.000000e+00 : f32
      %12 = vector.broadcast %cst_10 : f32 to vector<64x128xf32>
      %c0_11 = arith.constant 0 : index
      %c0_12 = arith.constant 0 : index
      %13 = vector.load %arg9[%c0_11, %c0_12] : memref<64x128xf32, #tpu.memory_space<vmem>>, vector<64x128xf32>
      tpu.vector_store %arg9[%c0_11, %c0_12], %12 {strides = array<i32>} : memref<64x128xf32, #tpu.memory_space<vmem>>, vector<64x128xf32>,
    } else {
    }
    %c0 = arith.constant 0 : index
    %c0_1 = arith.constant 0 : index
    %3 = vector.load %arg9[%c0, %c0_1] : memref<64x128xf32, #tpu.memory_space<vmem>>, vector<64x128xf32>
    %c0_2 = arith.constant 0 : index
    %c0_3 = arith.constant 0 : index
    %4 = vector.load %arg2[%c0_2, %c0_3] : memref<64x128xbf16, #tpu.memory_space<vmem>>, vector<64x128xbf16>
    %c0_4 = arith.constant 0 : index
    %c0_5 = arith.constant 0 : index
    %5 = vector.load %arg3[%c0_4, %c0_5] : memref<128x128xbf16, #tpu.memory_space<vmem>>, vector<128x128xbf16>
    %cst = arith.constant dense<0.000000e+00> : vector<64x128xf32>
    %6 = tpu.matmul %4, %5, %cst {dimension_numbers = #tpu.dot_dimension_numbers<[1], [0], [0], [1], [0, 0, 1, 1], [], []>} : vector<64x128xbf16>, vector<128x128xbf16>, vector<64x128xf32> -> vector<64x128xf32>
    %7 = arith.addf %3, %6 : vector<64x128xf32>
    %c0_6 = arith.constant 0 : index
    %c0_7 = arith.constant 0 : index
    %8 = vector.load %arg9[%c0_6, %c0_7] : memref<64x128xf32, #tpu.memory_space<vmem>>, vector<64x128xf32>
    tpu.vector_store %arg9[%c0_6, %c0_7], %7 {strides = array<i32>} : memref<64x128xf32, #tpu.memory_space<vmem>>, vector<64x128xf32>,
    %c0_i32_8 = arith.constant 0 : i32
    %9 = arith.cmpi eq, %arg1, %c0_i32_8 : i32
    %10 = arith.extui %9 : i1 to i32
    %c0_i32_9 = arith.constant 0 : i32
    %11 = arith.cmpi ne, %10, %c0_i32_9 : i32
    scf.if %11 {
      %c0_10 = arith.constant 0 : index
      %c0_11 = arith.constant 0 : index
      %12 = vector.load %arg9[%c0_10, %c0_11] : memref<64x128xf32, #tpu.memory_space<vmem>>, vector<64x128xf32>
      %c0_12 = arith.constant 0 : index
      %c0_13 = arith.constant 0 : index
      %13 = vector.load %arg5[%c0_12, %c0_13] : memref<64x1xf32, #tpu.memory_space<vmem>>, vector<64x1xf32>
      %14 = vector.broadcast %13 : vector<64x1xf32> to vector<64x128xf32>
      %15 = arith.mulf %12, %14 : vector<64x128xf32>
      %16 = arith.truncf %15 : vector<64x128xf32> to vector<64x128xbf16>
      %c0_14 = arith.constant 0 : index
      %c0_15 = arith.constant 0 : index
      %17 = vector.load %arg4[%c0_14, %c0_15] : memref<64x128xbf16, #tpu.memory_space<vmem>>, vector<64x128xbf16>
      %18 = tpu.concatenate %16, %17 in 1 : vector<64x128xbf16>, vector<64x128xbf16> -> vector<64x256xbf16>
      %c0_16 = arith.constant 0 : index
      %c0_17 = arith.constant 0 : index
      %19 = vector.load %arg6[%c0_16, %c0_17] : memref<256x128xbf16, #tpu.memory_space<vmem>>, vector<256x128xbf16>
      %cst_18 = arith.constant dense<0.000000e+00> : vector<64x128xf32>
      %20 = tpu.matmul %18, %19, %cst_18 {dimension_numbers = #tpu.dot_dimension_numbers<[1], [0], [0], [1], [0, 0, 1, 1], [], []>} : vector<64x256xbf16>, vector<256x128xbf16>, vector<64x128xf32> -> vector<64x128xf32>
      %c0_19 = arith.constant 0 : index
      %c0_20 = arith.constant 0 : index
      %21 = vector.load %arg7[%c0_19, %c0_20] : memref<1x128xf32, #tpu.memory_space<vmem>>, vector<1x128xf32>
      %22 = vector.broadcast %21 : vector<1x128xf32> to vector<64x128xf32>
      %23 = arith.addf %20, %22 : vector<64x128xf32>
      %cst_21 = arith.constant 0.000000e+00 : f32
      %24 = vector.broadcast %cst_21 : f32 to vector<64x128xf32>
      %25 = arith.maximumf %23, %24 : vector<64x128xf32>
      %26 = arith.truncf %25 : vector<64x128xf32> to vector<64x128xbf16>
      %c0_22 = arith.constant 0 : index
      %c0_23 = arith.constant 0 : index
      %27 = vector.load %arg8[%c0_22, %c0_23] : memref<64x128xbf16, #tpu.memory_space<vmem>>, vector<64x128xbf16>
      tpu.vector_store %arg8[%c0_22, %c0_23], %26 {strides = array<i32>} : memref<64x128xbf16, #tpu.memory_space<vmem>>, vector<64x128xbf16>,
    } else {
    }
    return
  }
  func.func @transform_0(%arg0: i32, %arg1: i32) -> (i32, i32) {
    %c0_i32 = arith.constant 0 : i32
    return %arg0, %arg1 : i32, i32
  }
  func.func @transform_1(%arg0: i32, %arg1: i32) -> (i32, i32) {
    %c0_i32 = arith.constant 0 : i32
    %c0_i32_0 = arith.constant 0 : i32
    return %arg1, %c0_i32 : i32, i32
  }
  func.func @transform_2(%arg0: i32, %arg1: i32) -> (i32, i32) {
    %c0_i32 = arith.constant 0 : i32
    %c0_i32_0 = arith.constant 0 : i32
    return %arg0, %c0_i32 : i32, i32
  }
  func.func @transform_3(%arg0: i32, %arg1: i32) -> (i32, i32) {
    %c0_i32 = arith.constant 0 : i32
    %c0_i32_0 = arith.constant 0 : i32
    return %arg0, %c0_i32 : i32, i32
  }
  func.func @transform_4(%arg0: i32, %arg1: i32) -> (i32, i32) {
    %c0_i32 = arith.constant 0 : i32
    %c0_i32_0 = arith.constant 0 : i32
    %c0_i32_1 = arith.constant 0 : i32
    return %c0_i32, %c0_i32_0 : i32, i32
  }
  func.func @transform_5(%arg0: i32, %arg1: i32) -> (i32, i32) {
    %c0_i32 = arith.constant 0 : i32
    %c0_i32_0 = arith.constant 0 : i32
    %c0_i32_1 = arith.constant 0 : i32
    return %c0_i32, %c0_i32_0 : i32, i32
  }
  func.func @transform_6(%arg0: i32, %arg1: i32) -> (i32, i32) {
    %c0_i32 = arith.constant 0 : i32
    %c0_i32_0 = arith.constant 0 : i32
    return %arg0, %c0_i32 : i32, i32
  }
}

</mosaic_0001>

<bundles_post_ra>
// kernel: tpu_custom_call.1
= control target key start
LH: loop header
LB: loop body
LE: loop exit
PB: predicated region body
PF: predicated region fallthrough
CT: control target
= control target key end

     0   :  { %s1940_s0 = inlined_call_operand.hbm [shape: bf16[128,128], index: 0, kind: input, shape index: {}]   ;;  %s1941_s1 = inlined_call_operand.hbm [shape: bf16[128,128], index: 1, kind: input, shape index: {}]   ;;  %s1942_s2 = inlined_call_operand.hbm [shape: bf16[128,128], index: 2, kind: input, shape index: {}]   ;;  %s1943_s3 = inlined_call_operand.vmem [shape: f32[128,1], index: 3, kind: input, shape index: {}]   ;;  %s1944_s4 = inlined_call_operand.vmem [shape: bf16[256,128], index: 4, kind: input, shape index: {}]   ;;  %s1945_s5 = inlined_call_operand.vmem [shape: f32[1,128], index: 5, kind: input, shape index: {}]   ;;  %s1946_s6 = inlined_call_operand.hbm [shape: bf16[128,128], index: 6, kind: output, shape index: {}]  }
   0x1   :  { %1955 = sst [smem:[#allocation14_spill]] %s1940_s0 }
   0x2   :  { %11 = vsyncpa [#allocation4], 0 }
   0x3   :  { %13 = vsyncpa [#allocation4 + $0x1], 0 }
   0x4   :  { %14 = vsyncpa [#allocation7], 0 }
   0x5   :  { %15 = vsyncpa [#allocation5], 0 }
   0x6   :  { %17 = vsyncpa [#allocation5 + $0x1], 0  ;;  %s1576_s21 = smov 0   ;;  %s1578_s22 = smov 0  }
   0x7   :  { %s1580_s23 = smov 0   ;;  %s1582_s24 = smov 0  }
   0x8   :  { %s1584_s25 = smov 0   ;;  %s1586_s26 = smov 0  }
   0x9 LB: > { %s35_s27 = sadd.s32 1, %s1526_s25  ;;  %s44_s28 = sadd.s32 1, %s1518_s23  ;;  %s1530_s26 = sphi %s1586_s26, %s23_s26   ;;  %s1526_s25 = sphi %s1584_s25, %s1979_s25   ;;  %s1522_s24 = sphi %s1582_s24, %s1978_s24   ;;  %s1518_s23 = sphi %s1580_s23, %s1977_s23   ;;  %s1514_s22 = sphi %s1578_s22, %s1976_s22   ;;  %s1510_s21 = sphi %s1576_s21, %s1975_s21  }
   0xa   : > { %p37_p0 = scmp.ge.s32.totalorder %s35_s27, 2  ;;  %p51_p1 = scmp.ne.s32.totalorder %s1518_s23, %s1514_s22 }
   0xb   : > { %p52_p2 = scmp.eq.s32.totalorder %s1530_s26, 0  ;;  %p1261_p6 = scmp.lt.s32.totalorder %s1530_s26, 2 }
   0xc   : > { %s1981_s27 = smov (%p37_p0, %s35_s27), 0  ;;  %s249_s7 = sand.u32 1, %s1530_s26  }
   0xd   : > { %p1616_p3 = por %p52_p2, %p51_p1  ;;  %s39_s30 = ssub.s32 %s1526_s25, %s1981_s27 }
   0xe   : > { %p42_p5 = scmp.eq.s32.totalorder %s39_s30, 0  ;;  %s251_s8 = sand.u32 1, %s1518_s23  }
   0xf   : > { %s1629_s10 = sshll.u32 %s251_s8, 5  ;;  %s1125_s11 = sshll.u32 %s1526_s25, 9 }
  0x10   : > { %s1627_s9 = scalar_select %p42_p5, %s1518_s23, %s44_s28  }
  0x11   : > { %s1957_s0 = sld [smem:[#allocation14_spill]]  ;;  %s253_s15 = scalar_lea.vmem [#allocation3], %s1629_s10 }
  0x12   : > { %s261_s16 = sshll.u32 %s253_s15, 4  ;;  %p1642_p7 = pnand %p1261_p6, %p1616_p3  ;;  %s1638_s16 = int_to_ptr.vmem [resolvable:$true] %s261_s16 }
  0x13   : > { %s1649_s20 = scalar_lea.hbm %s1942_s2, %s1125_s11  ;;  %s1651_s28 = scalar_lea.sflag [#allocation4], %s249_s7 }
  0x14   : > { %p1354_p9 = pneg %p1642_p7 }
  0x17   : > { %s1635_s14 = scalar_lea.hbm %s1957_s0, %s1125_s11  ;;  %s1357_s12 = scalar_lea.hbm %s1957_s0, 1024 }
  0x18   : > { %s1352_s30 = scalar_lea.hbm %s1635_s14, 512  ;;  %p1358_p12 = scmp.lt.u32.totalorder %s1635_s14, %s1957_s0 }
  0x19   : > { %p1353_p8 = scmp.ne.s32.totalorder %s1635_s14, %s1352_s30  ;;  %p1359_p13 = scmp.lt.u32.totalorder %s1357_s12, %s1352_s30 }
  0x1a   : > { %p1361_p2 = scmp.lt.u32.totalorder %s1352_s30, %s1635_s14 }
  0x1b   : > { %p1355_p10 = pnand %p1354_p9, %p1353_p8  ;;  %p1360_p0 = por %p1359_p13, %p1358_p12 }
  0x1d   : > { %p1356_p11 = pneg %p1355_p10  ;;  %p1362_p3 = por %p1361_p2, %p1360_p0 }
  0x1f   : > { %p1363_p5 = pnand %p1362_p3, %p1356_p11 }
  0x21   : > { %1366 = shalt.err (!%p1363_p5)
}
  0x22   : > { %s1367_s7 = scalar_lea.vmem %s1638_s16, 512  ;;  %s1532_s11 = smov [#allocation3]  }
  0x23   : > { %p1368_p6 = scmp.ne.s32.totalorder %s1638_s16, %s1367_s7  ;;  %s1372_s18 = sshll.u32 %s1532_s11, 4  ;;  %s1373_s18 = int_to_ptr.vmem [resolvable:$false] %s1372_s18 }
  0x24   : > { %s1374_s19 = scalar_lea.vmem %s1373_s18, 1024  ;;  %p1375_p4 = scmp.lt.s32.totalorder %s1638_s16, %s1373_s18 }
  0x25   : > { %p1370_p8 = pnand %p1368_p6, %p1354_p9  ;;  %p1376_p12 = scmp.lt.s32.totalorder %s1374_s19, %s1367_s7 }
  0x27   : > { %p1371_p10 = pneg %p1370_p8  ;;  %p1377_p13 = por %p1376_p12, %p1375_p4 }
  0x29   : > { %p1378_p0 = pnand %p1377_p13, %p1371_p10 }
  0x2b   : > { %1381 = shalt.err (!%p1378_p0)
}
  0x2c   : > { %s1947_s30 = smov 64   ;;  %s1949_s29 = smov 4  }
  0x2d   : > { %1252 = dma.hbm_to_vmem [thread:$0]  (!%p1642_p7), %s1635_s14, 512, %s1638_s16, %s1651_s28, %s1947_s30, %s1947_s30, %s1949_s29  }
  0x2e   : > { %s275_s8 = scalar_lea.vmem [#allocation8], %s1629_s10  ;;  %s1684_s13 = sadd.s32 4294967295, %s1530_s26  }
  0x2f   : > { %s282_s12 = sshll.u32 %s275_s8, 4  ;;  %s1062_s15 = sadd.s32 4294967294, %s1530_s26   ;;  %s1710_s12 = int_to_ptr.vmem [resolvable:$true] %s282_s12 }
  0x30   : > { %p57_p4 = scmp.ne.s32.totalorder %s1514_s22, %s1510_s21  ;;  %p1951_p11 = scmp.eq.s32.totalorder %s1684_s13, 0 }
  0x31   : > { %p201_p2 = scmp.eq.s32.totalorder %s1684_s13, 1  ;;  %p207_p3 = scmp.eq.s32.totalorder %s1062_s15, 1 }
  0x32   : > { %p1063_p5 = scmp.ge.s32.totalorder %s1530_s26, 1  ;;  %p1694_p6 = por %p1951_p11, %p57_p4 }
  0x33   : > { %p1701_p8 = por %p201_p2, %p51_p1  ;;  %p1705_p10 = por %p207_p3, %p57_p4 }
  0x34   : > { %s1959_s14 = scalar_select %p1694_p6, 1, 0 }
  0x35   : > { %s1960_s10 = scalar_select %p1701_p8, 1, 0 }
  0x36   : > { %s1961_s16 = scalar_select %p1705_p10, 1, 0 }
  0x37   : > { %p214_p12 = scmp.lt.s32.totalorder %s1530_s26, 3  ;;  %s1535_s11 = smov [#allocation6]  }
  0x38   : > { %s1716_s18 = sshll.u32 %s1535_s11, 4  ;;  %s1382_s19 = scalar_lea.hbm %s1649_s20, 512  ;;  %s230_s18 = int_to_ptr.vmem [resolvable:$true] %s1716_s18 }
  0x39   : > { %p1712_p13 = pnand %p1063_p5, %p214_p12  ;;  %p1383_p0 = scmp.ne.s32.totalorder %s1649_s20, %s1382_s19 }
  0x3a   : > { %s1387_s30 = scalar_lea.hbm %s1942_s2, 1024  ;;  %p1388_p3 = scmp.lt.u32.totalorder %s1649_s20, %s1942_s2 }
  0x3b   : > { %s1962_s7 = scalar_select %p1712_p13, 1, 0 }
  0x3c   : > { %p1385_p4 = pnand %p1383_p0, %p1354_p9  ;;  %p1389_p5 = scmp.lt.u32.totalorder %s1387_s30, %s1382_s19 }
  0x3d   : > { %p1391_p11 = scmp.lt.u32.totalorder %s1382_s19, %s1649_s20 }
  0x3e   : > { %p1386_p2 = pneg %p1385_p4  ;;  %p1390_p12 = por %p1389_p5, %p1388_p3 }
  0x40   : > { %p1392_p10 = por %p1391_p11, %p1390_p12 }
  0x42   : > { %p1393_p8 = pnand %p1392_p10, %p1386_p2 }
  0x44   : > { %1396 = shalt.err (!%p1393_p8)
}
  0x45   : > { %s1397_s11 = scalar_lea.vmem %s1710_s12, 512  ;;  %s1536_s8 = smov [#allocation8]  }
  0x46   : > { %p1398_p0 = scmp.ne.s32.totalorder %s1710_s12, %s1397_s11  ;;  %s1402_s15 = sshll.u32 %s1536_s8, 4  ;;  %s1403_s15 = int_to_ptr.vmem [resolvable:$false] %s1402_s15 }
  0x47   : > { %s1404_s0 = scalar_lea.vmem %s1403_s15, 1024  ;;  %p1405_p6 = scmp.lt.s32.totalorder %s1710_s12, %s1403_s15 }
  0x48   : > { %p1400_p4 = pnand %p1398_p0, %p1354_p9  ;;  %p1406_p3 = scmp.lt.s32.totalorder %s1404_s0, %s1397_s11 }
  0x4a   : > { %p1401_p1 = pneg %p1400_p4  ;;  %p1407_p5 = por %p1406_p3, %p1405_p6 }
  0x4c   : > { %p1408_p11 = pnand %p1407_p5, %p1401_p1 }
  0x4e   : > { %1411 = shalt.err (!%p1408_p11)
}
  0x4f   : > { %s1963_s30 = smov 4   ;;  %s1964_s29 = smov 64  }
  0x50   : > { %1255 = dma.hbm_to_vmem [thread:$0]  (!%p1642_p7), %s1649_s20, 512, %s1710_s12, %s1651_s28, %s1964_s29, %s1964_s29, %s1963_s30  }
  0x51   : > { %p1965_p9 = scmp.eq.s32.totalorder %s1684_s13, 0  ;;  %p1966_p8 = pneg %p1712_p13 }
  0x52   : > { %s1412_s8 = scalar_lea.hbm %s1941_s1, 1024 }
  0x53   : > { %p1753_p10 = pnand %p1966_p8, %p1965_p9  ;;  %p1413_p6 = scmp.ne.s32.totalorder %s1941_s1, %s1412_s8 }
  0x54   : > { %p1419_p12 = scmp.lt.u32.totalorder %s1412_s8, %s1941_s1 }
  0x55   : > { %p1414_p1 = pneg %p1753_p10 }
  0x57   : > { %p1415_p7 = pnand %p1414_p1, %p1413_p6 }
  0x59   : > { %p1416_p2 = pneg %p1415_p7 }
  0x5b   : > { %p1421_p0 = pnand %p1419_p12, %p1416_p2 }
  0x5d   : > { %1424 = shalt.err (!%p1421_p0)
}
  0x5e   : > { %s1425_s12 = scalar_lea.vmem %s230_s18, 1024  ;;  %p1433_p11 = scmp.lt.s32.totalorder %s230_s18, %s230_s18 }
  0x5f   : > { %p1426_p4 = scmp.ne.s32.totalorder %s230_s18, %s1425_s12  ;;  %p1434_p9 = scmp.lt.s32.totalorder %s1425_s12, %s1425_s12 }
  0x61   : > { %p1428_p3 = pnand %p1426_p4, %p1414_p1  ;;  %p1435_p8 = por %p1434_p9, %p1433_p11 }
  0x63   : > { %p1429_p5 = pneg %p1428_p3 }
  0x65   : > { %p1436_p13 = pnand %p1435_p8, %p1429_p5 }
  0x67   : > { %1439 = shalt.err (!%p1436_p13)
}
  0x68   : > { %1248 = dma.hbm_to_vmem [thread:$0]  (!%p1753_p10), %s1941_s1, 1024, %s230_s18, [#allocation7], %s1964_s29, %s1964_s29, %s1963_s30  }
  0x69   : > { %p1968_p6 = scmp.ne.s32.totalorder %s1962_s7, 0 }
  0x6a   : > { %s305_s8 = sand.u32 (!%p1968_p6), 1, %s1684_s13   ;;  %s307_s15 = sand.u32 (!%p1968_p6), 1, %s1514_s22  }
  0x6b   : > { %303 = sbr.rel (%p1968_p6) target bundleno = 636 (0x27c), region = 44  ;;  %s1782_s0 = sshll.u32 (!%p1968_p6), %s307_s15, 5 }
  0x6c   : > { %s306_s19 = scalar_lea.sflag (!%p1968_p6), [#allocation4], %s305_s8  ;;  %s1785_s20 = scalar_lea.vmem (!%p1968_p6), [#allocation3], %s1782_s0 }
  0x6d   : > { %p1969_p13 = scmp.ne.s32.totalorder (!%p1968_p6), %s1959_s14, 0 }
  0x72   : > { %1493 = dma.done.wait (%p1969_p13), %s306_s19, 512  }
  0x73   : > { %1495 = vsyncadd (%p1969_p13), %s306_s19, 4294966784  ;;  %p1970_p10 = scmp.eq.s32.totalorder %s1684_s13, 0 }
  0x75   : > { %1497 = dma.done.wait (%p1970_p10), [#allocation7], 1024   ;;  %p1971_p1 = pmov %p1970_p10 }
  0x76   : > { %s1796_s7 = scalar_lea.vmem [#allocation8], %s1782_s0 }
  0x77   : > { %1499 = vsyncadd (%p1971_p1), [#allocation7], 4294966272 }
  0x78   : > { %1501 = dma.done.wait (%p1969_p13), %s306_s19, 512  }
  0x79   : > { %1503 = vsyncadd (%p1969_p13), %s306_s19, 4294966784  ;;  %v1537_v0 = vmov 0   ;;  %s1077_s18 = sshll.u32 %s1522_s24, 3  ;;  %v1320_v1 = vld [vmem:[#allocation6] sm:$0xff]   ;;  %v1321_v2 = vld [vmem:[#allocation6 + $0x8] sm:$0xff]   ;;  %s1135_s12 = sshll.u32 %s1522_s24, 9 }
  0x7a   : > { %1318 = vset.pattern.permute.xlu0 %v1537_v0  ;;  %1319 = vset.pattern.permute.xlu1 %v1537_v0  ;;  %p365_p7 = scmp.lt.s32.totalorder %s1077_s18, 15  ;;  %v1322_v3 = vld [vmem:[#allocation6 + $0x10] sm:$0xff]   ;;  %v1323_v4 = vld [vmem:[#allocation6 + $0x18] sm:$0xff]   ;;  %v1328_v5 = vld [vmem:[%s1785_s20] sm:$0xff]   ;;  %s1888_s8 = scalar_lea.hbm %s1946_s6, %s1135_s12 }
  0x7b   : > { %1211 = vmatprep.subr.bf16.mxu0 %v1320_v1  ;;  %1227 = vmatprep.mubr.bf16.mxu0 %v1328_v5  ;;  %v1324_v6 = vld [vmem:[#allocation6 + $0x20] sm:$0xff]   ;;  %v1325_v9 = vld [vmem:[#allocation6 + $0x28] sm:$0xff]   ;;  %v1326_v16 = vld [vmem:[#allocation6 + $0x30] sm:$0xff]   ;;  %s1893_s19 = scalar_lea.sflag [#allocation5], %s307_s15  ;;  %p1972_p12 = scmp.ne.s32.totalorder %s1960_s10, 0 }
  0x7c   : > { %s1983_s18 = smov (!%p365_p7, %s1077_s18), 15  ;;  %1212 = vmatpush3.bf16.msra.mxu0 %v1320_v1  ;;  %v1332_v12 = vld [vmem:[%s1944_s4 + $0x40] sm:$0xff]   ;;  %v1334_v15 = vld [vmem:[%s1944_s4 + $0x48] sm:$0xff]   ;;  %v1336_v19 = vld [vmem:[%s1944_s4 + $0x50] sm:$0xff]   ;;  %s1538_s24 = smov [#allocation9]  }
  0x7d   : > { %1213 = vmatprep.subr.bf16.mxu0 %v1321_v2  ;;  %s1078_s13 = sshll.u32 %s1983_s18, 3  ;;  %v1333_v14 = vld [vmem:[%s1944_s4] sm:$0xff]   ;;  %1171 = vmatprep.subr.bf16.mxu1 %v1332_v12  ;;  %v1335_v18 = vld [vmem:[%s1944_s4 + $0x8] sm:$0xff]   ;;  %v1327_v21 = vld [vmem:[#allocation6 + $0x38] sm:$0xff]   ;;  %s1444_s18 = sshll.u32 %s1538_s24, 4  ;;  %s1445_s18 = int_to_ptr.vmem [resolvable:$false] %s1444_s18 }
  0x7e   : > { %s1807_s29 = scalar_lea.vmem %s1943_s3, %s1078_s13  ;;  %1172 = vmatpush3.bf16.msra.mxu1 %v1333_v14  ;;  %v1337_v23 = vld [vmem:[%s1944_s4 + $0x10] sm:$0xff]   ;;  %v1338_v24 = vld [vmem:[%s1944_s4 + $0x58] sm:$0xff]   ;;  %v1340_v26 = vld [vmem:[%s1944_s4 + $0x60] sm:$0xff]   ;;  %s1446_s13 = scalar_lea.vmem %s1445_s18, 1024 }
  0x7f   : > { %v580_v7 = vld [vmem:[%s1807_s29] sm:$0xff]  ;;  %v582_v8 = vld [vmem:[%s1807_s29 + $0x10] sm:$0xff]  ;;  %v581_v10 = vld [vmem:[%s1807_s29 + $0x8] sm:$0xff]  ;;  %1173 = vmatprep.subr.bf16.mxu1 %v1334_v15 }
  0x80   : > { %1214 = vmatpush3.bf16.msra.mxu0 %v1321_v2  ;;  %590 = vperm.xlu0 %1318, %v580_v7   ;;  %v583_v11 = vld [vmem:[%s1807_s29 + $0x18] sm:$0xff]  ;;  %v584_v13 = vld [vmem:[%s1807_s29 + $0x20] sm:$0xff]  ;;  %v585_v17 = vld [vmem:[%s1807_s29 + $0x28] sm:$0xff] }
  0x81   : > { %1215 = vmatprep.subr.bf16.mxu0 %v1322_v3  ;;  %600 = vperm.xlu1 %1319, %v582_v8   ;;  %v586_v20 = vld [vmem:[%s1807_s29 + $0x30] sm:$0xff]  ;;  %v587_v22 = vld [vmem:[%s1807_s29 + $0x38] sm:$0xff]  ;;  %v1329_v27 = vld [vmem:[%s1785_s20 + $0x8] sm:$0xff]  }
  0x82   : > { %1174 = vmatpush3.bf16.msra.mxu1 %v1335_v18  ;;  %v1339_v25 = vld [vmem:[%s1944_s4 + $0x18] sm:$0xff]   ;;  %v1330_v28 = vld [vmem:[%s1785_s20 + $0x10] sm:$0xff]   ;;  %v1341_v29 = vld [vmem:[%s1944_s4 + $0x20] sm:$0xff]  }
  0x83   : > { %1175 = vmatprep.subr.bf16.mxu1 %v1336_v19  ;;  %v1342_v30 = vld [vmem:[%s1944_s4 + $0x68] sm:$0xff]   ;;  %v1331_v32 = vld [vmem:[%s1785_s20 + $0x18] sm:$0xff]   ;;  %v1344_v33 = vld [vmem:[%s1944_s4 + $0x70] sm:$0xff]  }
  0x84   : > { %1216 = vmatpush3.bf16.msra.mxu0 %v1322_v3  ;;  %595 = vperm.xlu0 %1318, %v581_v10   ;;  %v1343_v31 = vld [vmem:[%s1944_s4 + $0x28] sm:$0xff]   ;;  %v1345_v34 = vld [vmem:[%s1944_s4 + $0x30] sm:$0xff]   ;;  %v1346_v35 = vld [vmem:[%s1944_s4 + $0x78] sm:$0xff]  }
  0x85   : > { %1217 = vmatprep.subr.bf16.mxu0 %v1323_v4  ;;  %605 = vperm.xlu1 %1319, %v583_v11   ;;  %v1347_v36 = vld [vmem:[%s1944_s4 + $0x38] sm:$0xff]   ;;  %v1348_v37 = vld [vmem:[%s1796_s7] sm:$0xff]   ;;  %v1349_v53 = vld [vmem:[%s1796_s7 + $0x8] sm:$0xff]  }
  0x86   : > { %1176 = vmatpush3.bf16.msra.mxu1 %v1337_v23  ;;  %839 = vmatprep.mubr.bf16.mxu1 %v1348_v37  ;;  %v1350_v2 = vld [vmem:[%s1796_s7 + $0x10] sm:$0xff]  }
  0x87   : > { %1177 = vmatprep.subr.bf16.mxu1 %v1338_v24 }
  0x88   : > { %1218 = vmatpush3.bf16.msra.mxu0 %v1323_v4  ;;  %610 = vperm.xlu0 %1318, %v584_v13   ;;  %v1351_v4 = vld [vmem:[%s1796_s7 + $0x18] sm:$0xff]   ;;  %s1876_s7 = scalar_lea.vmem [#allocation9], %s1782_s0 }
  0x89   : > { %1219 = vmatprep.subr.bf16.mxu0 %v1324_v6  ;;  %615 = vperm.xlu1 %1319, %v585_v17   ;;  %s934_s0 = sshll.u32 %s1876_s7, 4  ;;  %s1883_s0 = int_to_ptr.vmem [resolvable:$true] %s934_s0 }
  0x8a   : > { %1178 = vmatpush3.bf16.msra.mxu1 %v1339_v25  ;;  %s1440_s29 = scalar_lea.vmem %s1883_s0, 512  ;;  %p1447_p3 = scmp.lt.s32.totalorder %s1883_s0, %s1445_s18 }
  0x8b   : > { %1179 = vmatprep.subr.bf16.mxu1 %v1340_v26  ;;  %p1441_p2 = scmp.ne.s32.totalorder %s1883_s0, %s1440_s29  ;;  %p1448_p5 = scmp.lt.s32.totalorder %s1446_s13, %s1440_s29 }
  0x8c   : > { %1220 = vmatpush3.bf16.msra.mxu0 %v1324_v6  ;;  %620 = vperm.xlu0 %1318, %v586_v20   ;;  %v1095_v6 = vld [vmem:[%s1945_s5] ss:$0 sm:$0xff] }
  0x8d   : > { %1221 = vmatprep.subr.bf16.mxu0 %v1325_v9  ;;  %625 = vperm.xlu1 %1319, %v587_v22   ;;  %p1442_p0 = pnand %p1441_p2, %p1972_p12  ;;  %p1449_p11 = por %p1448_p5, %p1447_p3 }
  0x8e   : > { %1180 = vmatpush3.bf16.msra.mxu1 %v1341_v29 }
  0x8f   : > { %1181 = vmatprep.subr.bf16.mxu1 %v1342_v30  ;;  %p1443_p4 = pneg %p1442_p0 }
  0x90   : > { %1222 = vmatpush3.bf16.msra.mxu0 %v1325_v9 }
  0x91   : > { %1223 = vmatprep.subr.bf16.mxu0 %v1326_v16  ;;  %p1450_p9 = pnand %p1449_p11, %p1443_p4 }
  0x92   : > { %1182 = vmatpush3.bf16.msra.mxu1 %v1343_v31 }
  0x93   : > { %1183 = vmatprep.subr.bf16.mxu1 %v1344_v33 }
  0x94   : > { %1224 = vmatpush3.bf16.msra.mxu0 %v1326_v16 }
  0x95   : > { %1225 = vmatprep.subr.bf16.mxu0 %v1327_v21 }
  0x96   : > { %1184 = vmatpush3.bf16.msra.mxu1 %v1345_v34 }
  0x97   : > { %1185 = vmatprep.subr.bf16.mxu1 %v1346_v35 }
  0x98   : > { %1226 = vmatpush3.bf16.msra.mxu0 %v1327_v21 }
  0x9a   : > { %1186 = vmatpush3.bf16.msra.mxu1 %v1347_v36 }
  0x9b   : > { %1228 = vmatmul.mubr.bf16.vlgmr.msra.gmra.mrb[0].mxu0 %v1329_v27 }
  0x9c   : > { %1231 = vmatprep.mubr.bf16.mxu0 %v1330_v28 }
  0xa3   : > { %1232 = vmatmul.mubr.bf16.gmra.mrb[4].mxu0 %v1331_v32 }
  0xff   : > { %v591_v38 = vpop.permute.xlu0 %590 }
 0x100   : > { %v601_v39 = vpop.permute.xlu1 %600 }
 0x103   : > { %v596_v40 = vpop.permute.xlu0 %595 }
 0x104   : > { %v606_v41 = vpop.permute.xlu1 %605 }
 0x107   : > { %v611_v45 = vpop.permute.xlu0 %610 }
 0x108   : > { %v616_v50 = vpop.permute.xlu1 %615 }
 0x10b   : > { %v621_v56 = vpop.permute.xlu0 %620 }
 0x10c   : > { %v626_v58 = vpop.permute.xlu1 %625 }
 0x16e   : > { %v1229_v42 = vpop.f32.mrb[0].mxu0 }
 0x16f   : > { %v522_v43 = vpop.f32.mrb[1].mxu0  ;;  %v630_v46 = vmul.f32 %v1229_v42, %v601_v39 }
 0x170   : > { %v1230_v44 = vpop.f32.mrb[2].mxu0  ;;  %v628_v49 = vmul.f32 %v591_v38, %v522_v43 }
 0x171   : > { %v631_v47 = vmul.f32 %v1230_v44, %v606_v41  ;;  %v525_v48 = vpop.f32.mrb[3].mxu0 }
 0x172   : > { %v629_v51 = vmul.f32 %v596_v40, %v525_v48 }
 0x173   : > { %v637_v52 = vpack.c.bf16 %v631_v47, %v630_v46 }
 0x174   : > { %v636_v54 = vpack.c.bf16 %v629_v51, %v628_v49 }
 0x176   : > { %v1233_v55 = vpop.f32.mrb[4].mxu0  ;;  %840 = vmatmul.mubr.bf16.vlgmr.msra.gmra.mrb[0].mxu1 %v636_v54 }
 0x177   : > { %v538_v57 = vpop.f32.mrb[5].mxu0  ;;  %847 = vmatprep.mubr.bf16.mxu1 %v1349_v53  ;;  %v634_v60 = vmul.f32 %v1233_v55, %v621_v56 }
 0x178   : > { %v1234_v59 = vpop.f32.mrb[6].mxu0  ;;  %v632_v63 = vmul.f32 %v611_v45, %v538_v57 }
 0x179   : > { %v635_v61 = vmul.f32 %v1234_v59, %v626_v58  ;;  %v541_v62 = vpop.f32.mrb[7].mxu0 }
 0x17a   : > { %v633_v0 = vmul.f32 %v616_v50, %v541_v62 }
 0x17b   : > { %v639_v1 = vpack.c.bf16 %v635_v61, %v634_v60 }
 0x17c   : > { %v638_v3 = vpack.c.bf16 %v633_v0, %v632_v63 }
 0x17e   : > { %848 = vmatmul.mubr.bf16.gmra.mrb[4].mxu1 %v637_v52 }
 0x17f   : > { %855 = vmatprep.mubr.bf16.mxu1 %v1350_v2 }
 0x186   : > { %856 = vmatmul.mubr.bf16.gmra.mrb[8].mxu1 %v638_v3 }
 0x187   : > { %863 = vmatprep.mubr.bf16.mxu1 %v1351_v4 }
 0x18e   : > { %864 = vmatmul.mubr.bf16.gmra.mrb[12].mxu1 %v639_v1 }
 0x249   : > { %v1187_v5 = vpop.f32.mrb[0].mxu1 }
 0x24a   : > { %v1188_v7 = vpop.f32.mrb[1].mxu1 }
 0x24b   : > { %v1189_v8 = vadd.f32 %v1188_v7, %v1187_v5  ;;  %v1190_v9 = vpop.f32.mrb[2].mxu1 }
 0x24c   : > { %v1191_v10 = vpop.f32.mrb[3].mxu1 }
 0x24d   : > { %v842_v11 = vadd.f32 %v1189_v8, %v1095_v6  ;;  %v1192_v12 = vadd.f32 %v1191_v10, %v1190_v9 }
 0x24f   : > { %v845_v13 = vadd.f32 %v1192_v12, %v1095_v6  ;;  %v872_v14 = vmax.f32 %v842_v11, 0.0 }
 0x251   : > { %v873_v15 = vmax.f32 %v845_v13, 0.0  ;;  %v1193_v16 = vpop.f32.mrb[4].mxu1 }
 0x252   : > { %v1194_v17 = vpop.f32.mrb[5].mxu1 }
 0x253   : > { %v1139_v18 = vpack.c.bf16 %v873_v15, %v872_v14  ;;  %v1195_v19 = vadd.f32 %v1194_v17, %v1193_v16  ;;  %v1196_v20 = vpop.f32.mrb[6].mxu1 }
 0x254   : > { %v1197_v21 = vpop.f32.mrb[7].mxu1 }
 0x255   : > { %1140 = vst [vmem:[%s1876_s7] sm:$0xff] %v1139_v18   ;;  %v850_v22 = vadd.f32 %v1195_v19, %v1095_v6  ;;  %v1198_v23 = vadd.f32 %v1197_v21, %v1196_v20 }
 0x257   : > { %v853_v24 = vadd.f32 %v1198_v23, %v1095_v6  ;;  %v874_v25 = vmax.f32 %v850_v22, 0.0 }
 0x259   : > { %v875_v26 = vmax.f32 %v853_v24, 0.0  ;;  %v1199_v27 = vpop.f32.mrb[8].mxu1 }
 0x25a   : > { %v1200_v28 = vpop.f32.mrb[9].mxu1 }
 0x25b   : > { %v1144_v29 = vpack.c.bf16 %v875_v26, %v874_v25  ;;  %v1201_v30 = vadd.f32 %v1200_v28, %v1199_v27  ;;  %v1202_v31 = vpop.f32.mrb[10].mxu1 }
 0x25c   : > { %v1203_v32 = vpop.f32.mrb[11].mxu1 }
 0x25d   : > { %1156 = vst [vmem:[%s1876_s7 + $0x8] sm:$0xff] %v1144_v29   ;;  %v858_v33 = vadd.f32 %v1201_v30, %v1095_v6  ;;  %v1204_v34 = vadd.f32 %v1203_v32, %v1202_v31 }
 0x25f   : > { %v861_v35 = vadd.f32 %v1204_v34, %v1095_v6  ;;  %v876_v36 = vmax.f32 %v858_v33, 0.0 }
 0x261   : > { %v877_v37 = vmax.f32 %v861_v35, 0.0  ;;  %v1205_v38 = vpop.f32.mrb[12].mxu1 }
 0x262   : > { %v1206_v39 = vpop.f32.mrb[13].mxu1 }
 0x263   : > { %v1149_v40 = vpack.c.bf16 %v877_v37, %v876_v36  ;;  %v1207_v41 = vadd.f32 %v1206_v39, %v1205_v38  ;;  %v1208_v42 = vpop.f32.mrb[14].mxu1 }
 0x264   : > { %v1209_v43 = vpop.f32.mrb[15].mxu1 }
 0x265   : > { %1157 = vst [vmem:[%s1876_s7 + $0x10] sm:$0xff] %v1149_v40   ;;  %v866_v44 = vadd.f32 %v1207_v41, %v1095_v6  ;;  %v1210_v45 = vadd.f32 %v1209_v43, %v1208_v42 }
 0x267   : > { %v869_v46 = vadd.f32 %v1210_v45, %v1095_v6  ;;  %v878_v47 = vmax.f32 %v866_v44, 0.0 }
 0x269   : > { %v879_v48 = vmax.f32 %v869_v46, 0.0 }
 0x26b   : > { %v1154_v49 = vpack.c.bf16 %v879_v48, %v878_v47 }
 0x26d   : > { %1158 = vst [vmem:[%s1876_s7 + $0x18] sm:$0xff] %v1154_v49  }
 0x26e   : > { %1453 = shalt.err (!%p1450_p9)
}
 0x26f   : > { %s1454_s15 = scalar_lea.hbm %s1888_s8, 512  ;;  %s1458_s20 = scalar_lea.hbm %s1946_s6, 1024 }
 0x270   : > { %p1455_p8 = scmp.ne.s32.totalorder %s1888_s8, %s1454_s15  ;;  %p1459_p10 = scmp.lt.u32.totalorder %s1888_s8, %s1946_s6 }
 0x271   : > { %p1460_p1 = scmp.lt.u32.totalorder %s1458_s20, %s1454_s15  ;;  %p1462_p2 = scmp.lt.u32.totalorder %s1454_s15, %s1888_s8 }
 0x272   : > { %p1456_p6 = pnand %p1455_p8, %p1972_p12 }
 0x273   : > { %p1461_p7 = por %p1460_p1, %p1459_p10 }
 0x274   : > { %p1457_p13 = pneg %p1456_p6 }
 0x275   : > { %p1463_p0 = por %p1462_p2, %p1461_p7 }
 0x277   : > { %p1464_p4 = pnand %p1463_p0, %p1457_p13 }
 0x279   : > { %1467 = shalt.err (!%p1464_p4)
}
 0x27a   : > { %s1539_s12 = smov 64   ;;  %s1540_s11 = smov 4  }
 0x27b   : > { %1243 = dma.vmem_to_hbm [thread:$0]  (%p1972_p12), %s1883_s0, 512, %s1888_s8, %s1893_s19, %s1539_s12, %s1539_s12, %s1540_s11  }
 0x27c PF: > { %s949_s17 = sand.u32 1, %s1510_s21   ;;  %p1973_p3 = scmp.ne.s32.totalorder %s1961_s16, 0 }
 0x27d   : > { %p1974_p5 = scmp.ge.s32.totalorder %s1530_s26, 2  ;;  %s950_s29 = scalar_lea.sflag [#allocation5], %s949_s17 }
 0x27f   : > { %p1257_p11 = pnand %p1974_p5, %p1973_p3 }
 0x281   : > { %1505 = dma.done.wait (!%p1257_p11), %s950_s29, 512  }
 0x282   : > { %1507 = vsyncadd (!%p1257_p11), %s950_s29, 4294966784  ;;  %s23_s26 = sadd.s32 1, %s1530_s26   ;;  %s1975_s21 = smov %s1514_s22 }
 0x283   : > { %p20_p9 = scmp.ge.s32.totalorder %s23_s26, 4   ;;  %s1976_s22 = smov %s1518_s23 }
 0x284   : > { %s1977_s23 = smov %s1627_s9  ;;  %s1978_s24 = smov %s1526_s25 }
 0x285   : > { %s1979_s25 = smov %s1981_s27  ;;  %22 = sbr.rel (!%p20_p9) target bundleno = 9 (0x9), region = 116 }
 0x28c   :  { %955 = vsyncpa [#allocation4], 1 }
 0x28d   :  { %957 = vsyncpa [#allocation4 + $0x1], 1 }
 0x28e   :  { %958 = vsyncpa [#allocation7], 1 }
 0x28f   :  { %959 = vsyncpa [#allocation5], 1 }
 0x290   :  { %961 = vsyncpa [#allocation5 + $0x1], 1 }

</bundles_post_ra>
